<compile_context>
chip_gen: v7x
topology: tpu7x:2x2x1
jax: 0.10.0
libtpu: 0.0.40
codegen_flags: <defaults>
</compile_context>

<pallas_src>
import functools

import jax
import jax.numpy as jnp
from jax.experimental import pallas as pl
from jax.experimental.pallas import tpu as pltpu


# ---------------------------------------------------------------------------
# Fused Pallas kernel: embedding gather (one-hot @ table) -> identity encode
# -> decoder Linear(H, L) -> argmax over labels.  Transposed orientation:
# tokens are in the lane dimension end-to-end.
# ---------------------------------------------------------------------------
def _fused_tagger_kernel(wid_ref, cid_ref, wembT_ref, cembT_ref,
                         wdecT_ref, cdecT_ref, b_ref, preds_ref):
    # wid_ref/cid_ref: (1, tm)  int32   token-id tile (tokens in lanes)
    # wembT_ref:       (Dw, Vw) f32     word embedding table, transposed
    # cembT_ref:       (Dc, Vc) f32     char embedding table, transposed
    # wdecT_ref:       (L, Dw)  f32     decoder weight rows for the word features
    # cdecT_ref:       (L, Dc)  f32     decoder weight rows for the char features
    # b_ref:           (L, 1)   f32     decoder bias column
    # preds_ref:       (1, tm)  int32   argmax over labels, lane-dense
    tm = wid_ref.shape[1]
    vw = wembT_ref.shape[1]
    vc = cembT_ref.shape[1]
    n_labels = wdecT_ref.shape[0]

    wid = wid_ref[...]                                   # (1, tm)
    cid = cid_ref[...]                                   # (1, tm)

    # embed(): gather expressed as one-hot matmul (vocab is tiny -> MXU work).
    oh_w = (jax.lax.broadcasted_iota(jnp.int32, (vw, tm), 0) == wid).astype(jnp.float32)
    oh_c = (jax.lax.broadcasted_iota(jnp.int32, (vc, tm), 0) == cid).astype(jnp.float32)
    word_eT = jnp.dot(wembT_ref[...], oh_w, preferred_element_type=jnp.float32)  # (Dw, tm)
    char_eT = jnp.dot(cembT_ref[...], oh_c, preferred_element_type=jnp.float32)  # (Dc, tm)

    # encode(): identity (abstract in the base class); dropout identity (eval).
    # decoder: Linear(H, L) on concat([word_e, char_e], -1), written in split
    # form (mathematically identical, avoids an in-kernel lane concat).
    logitsT = (jnp.dot(wdecT_ref[...], word_eT, preferred_element_type=jnp.float32)
               + jnp.dot(cdecT_ref[...], char_eT, preferred_element_type=jnp.float32)
               + b_ref[...])                             # (L, tm), labels in sublanes

    # torch.max(probv, 2): argmax over labels (sublane axis), first index on ties.
    lbl = jax.lax.broadcasted_iota(jnp.int32, (n_labels, tm), 0)
    maxv = jnp.max(logitsT, axis=0, keepdims=True)       # (1, tm)
    cand = jnp.where(logitsT == maxv, lbl, jnp.int32(n_labels))
    preds_ref[...] = jnp.min(cand, axis=0, keepdims=True).astype(jnp.int32)


def _choose_tile(n, cap=1024):
    # Multiple of 256 (v6e MXU M-dim; also a multiple of 128 for v5e), capped
    # so the per-step VMEM footprint stays tiny even on v7x (64 MiB physical).
    m = ((max(n, 1) + 255) // 256) * 256
    return min(m, cap)


@functools.partial(jax.jit, static_argnames=("tm",))
def tagger_unaries_argmax(params, word_ids, char_ids, *, tm):
    """word_ids/char_ids: time-major (T, B) int32.  Returns batch-major (B, T) preds."""
    T, B = word_ids.shape
    n = T * B
    n_pad = ((n + tm - 1) // tm) * tm
    n_tiles = n_pad // tm

    # Flatten token-major (same order as output.view(T*B, -1)), pad to the tile,
    # and lay the ids out lane-dense: (n_tiles, tm) with tokens along lanes.
    wid = jnp.pad(word_ids.reshape(n), (0, n_pad - n)).reshape(n_tiles, tm)
    cid = jnp.pad(char_ids.reshape(n), (0, n_pad - n)).reshape(n_tiles, tm)

    wembT = params["word_emb"].T                       # (Dw, Vw)
    cembT = params["char_emb"].T                       # (Dc, Vc)
    dw = wembT.shape[0]
    wdecT = params["dec_w"][:dw].T                     # (L, Dw)
    cdecT = params["dec_w"][dw:].T                     # (L, Dc)
    bcol = params["dec_b"].reshape(-1, 1)              # (L, 1)

    # NOTE: the table/weight blocks have constant index maps; they are small
    # enough (~7 KB total) that default double-buffering is negligible.
    preds2d = pl.pallas_call(
        _fused_tagger_kernel,
        out_shape=jax.ShapeDtypeStruct((n_tiles, tm), jnp.int32),
        grid_spec=pltpu.PrefetchScalarGridSpec(
            num_scalar_prefetch=0,
            grid=(n_tiles,),
            in_specs=[
                pl.BlockSpec((1, tm), lambda i: (i, 0)),        # word ids tile
                pl.BlockSpec((1, tm), lambda i: (i, 0)),        # char ids tile
                pl.BlockSpec(wembT.shape, lambda i: (0, 0)),    # word table (resident)
                pl.BlockSpec(cembT.shape, lambda i: (0, 0)),    # char table (resident)
                pl.BlockSpec(wdecT.shape, lambda i: (0, 0)),    # decoder W (word rows)
                pl.BlockSpec(cdecT.shape, lambda i: (0, 0)),    # decoder W (char rows)
                pl.BlockSpec(bcol.shape, lambda i: (0, 0)),     # decoder bias
            ],
            out_specs=pl.BlockSpec((1, tm), lambda i: (i, 0)),  # lane-dense preds
        ),
        compiler_params=pltpu.CompilerParams(
            dimension_semantics=("parallel",),
        ),
    )(wid, cid, wembT, cembT, wdecT, cdecT, bcol)

    # Padded rows carry argmax-of-(bias + row-0 embeddings); slice them off.
    preds = preds2d.reshape(n_pad)[:n].reshape(T, B)    # time-major (T, B)
    return preds.T                                      # preds.transpose(0, 1) -> (B, T)


# ---------------------------------------------------------------------------
# Host-side glue: matches TaggerModelBase.forward (returns the ragged pred_list).
# ---------------------------------------------------------------------------
def tagger_forward(params, inputs):
    """inputs: dict with 'word'/'char' int32 (T, B) time-major and 'lengths' int32 (B,)."""
    word, char, lengths = inputs["word"], inputs["char"], inputs["lengths"]
    T, B = word.shape
    tm = _choose_tile(T * B)

    preds_bt = tagger_unaries_argmax(params, word, char, tm=tm)   # (B, T), on device

    # Single device->host transfer, then ragged slicing on host
    # (no per-row int() synchronization).
    preds_host, lengths_host = jax.device_get((preds_bt, lengths))
    pred_list = [preds_host[i, : int(lengths_host[i])] for i in range(B)]
    return preds_bt, pred_list


def make_params(key, vocab_word=50, vocab_char=30, d_word=24, d_char=8, n_labels=5):
    k1, k2, k3, k4 = jax.random.split(key, 4)
    h = d_word + d_char
    return {
        "word_emb": jax.random.normal(k1, (vocab_word, d_word), jnp.float32) * 0.1,
        "char_emb": jax.random.normal(k2, (vocab_char, d_char), jnp.float32) * 0.1,
        "dec_w": jax.random.normal(k3, (h, n_labels), jnp.float32) * 0.1,
        "dec_b": jax.random.normal(k4, (n_labels,), jnp.float32) * 0.1,
    }


if __name__ == "__main__":
    key = jax.random.PRNGKey(0)
    pkey, wkey, ckey = jax.random.split(key, 3)

    T, B = 8, 2
    params = make_params(pkey)

    inputs = {
        # time-major token ids, matching PyTorch input_tensor's transpose(0,1)
        "word": jax.random.randint(wkey, (T, B), 0, 50, dtype=jnp.int32),
        "char": jax.random.randint(ckey, (T, B), 0, 30, dtype=jnp.int32),
        "lengths": jnp.array([8, 5], dtype=jnp.int32),
    }

    preds_bt, pred_list = tagger_forward(params, inputs)
    jax.block_until_ready(preds_bt)

    # Plain-JAX reference: embed -> identity encode -> Linear -> argmax.
    word_e = jnp.take(params["word_emb"], inputs["word"], axis=0)
    char_e = jnp.take(params["char_emb"], inputs["char"], axis=0)
    x = jnp.concatenate([word_e, char_e], axis=2).reshape(T * B, -1)
    ref_logits = (x @ params["dec_w"] + params["dec_b"]).reshape(T, B, -1)
    ref_preds = jnp.argmax(ref_logits, axis=2).T                   # (B, T)

    assert jnp.array_equal(preds_bt, ref_preds), "argmax mismatch"
    lens_host = jax.device_get(inputs["lengths"])
    assert all(int(p.shape[0]) == int(l) for p, l in zip(pred_list, lens_host))
    assert all(
        jnp.array_equal(jnp.asarray(p), ref_preds[i, : int(lens_host[i])])
        for i, p in enumerate(pred_list)
    )

    print("KERNEL_OK")
</pallas_src>

<mosaic_0001>
module attributes {stable_mosaic.version = 11 : i64} {
  func.func @_fused_tagger_kernel(%arg0: i32, %arg1: memref<1x256xi32, #tpu.memory_space<vmem>>, %arg2: memref<1x256xi32, #tpu.memory_space<vmem>>, %arg3: memref<24x50xf32, #tpu.memory_space<vmem>>, %arg4: memref<8x30xf32, #tpu.memory_space<vmem>>, %arg5: memref<5x24xf32, #tpu.memory_space<vmem>>, %arg6: memref<5x8xf32, #tpu.memory_space<vmem>>, %arg7: memref<5x1xf32, #tpu.memory_space<vmem>>, %arg8: memref<1x256xi32, #tpu.memory_space<vmem>>) attributes {dimension_semantics = [#tpu.dimension_semantics<parallel>], iteration_bounds = array<i64: 1>, scalar_prefetch = 0 : i64, scratch_operands = 0 : i64, tpu.core_type = #tpu.core_type<tc>, window_params = [{transform_indices = @transform_0, window_bounds = array<i64: 1, 256>}, {transform_indices = @transform_1, window_bounds = array<i64: 1, 256>}, {pipeline_mode = #tpu.pipeline_mode<synchronous>, transform_indices = @transform_2, window_bounds = array<i64: 24, 50>}, {pipeline_mode = #tpu.pipeline_mode<synchronous>, transform_indices = @transform_3, window_bounds = array<i64: 8, 30>}, {pipeline_mode = #tpu.pipeline_mode<synchronous>, transform_indices = @transform_4, window_bounds = array<i64: 5, 24>}, {pipeline_mode = #tpu.pipeline_mode<synchronous>, transform_indices = @transform_5, window_bounds = array<i64: 5, 8>}, {pipeline_mode = #tpu.pipeline_mode<synchronous>, transform_indices = @transform_6, window_bounds = array<i64: 5, 1>}, {transform_indices = @transform_7, window_bounds = array<i64: 1, 256>}]} {
    %c0 = arith.constant 0 : index
    %c0_0 = arith.constant 0 : index
    %0 = vector.load %arg1[%c0, %c0_0] : memref<1x256xi32, #tpu.memory_space<vmem>>, vector<1x256xi32>
    %c0_1 = arith.constant 0 : index
    %c0_2 = arith.constant 0 : index
    %1 = vector.load %arg2[%c0_1, %c0_2] : memref<1x256xi32, #tpu.memory_space<vmem>>, vector<1x256xi32>
    %2 = tpu.iota {dimensions = array<i32: 0>} : vector<50x256xi32>
    %3 = vector.broadcast %0 : vector<1x256xi32> to vector<50x256xi32>
    %4 = arith.cmpi eq, %2, %3 : vector<50x256xi32>
    %5 = arith.extui %4 : vector<50x256xi1> to vector<50x256xi32>
    %6 = arith.sitofp %5 : vector<50x256xi32> to vector<50x256xf32>
    %7 = tpu.iota {dimensions = array<i32: 0>} : vector<30x256xi32>
    %8 = vector.broadcast %1 : vector<1x256xi32> to vector<30x256xi32>
    %9 = arith.cmpi eq, %7, %8 : vector<30x256xi32>
    %10 = arith.extui %9 : vector<30x256xi1> to vector<30x256xi32>
    %11 = arith.sitofp %10 : vector<30x256xi32> to vector<30x256xf32>
    %c0_3 = arith.constant 0 : index
    %c0_4 = arith.constant 0 : index
    %12 = vector.load %arg3[%c0_3, %c0_4] : memref<24x50xf32, #tpu.memory_space<vmem>>, vector<24x50xf32>
    %cst = arith.constant dense<0.000000e+00> : vector<24x256xf32>
    %13 = tpu.matmul %12, %6, %cst {dimension_numbers = #tpu.dot_dimension_numbers<[1], [0], [0], [1], [0, 0, 1, 1], [], []>} : vector<24x50xf32>, vector<50x256xf32>, vector<24x256xf32> -> vector<24x256xf32>
    %c0_5 = arith.constant 0 : index
    %c0_6 = arith.constant 0 : index
    %14 = vector.load %arg4[%c0_5, %c0_6] : memref<8x30xf32, #tpu.memory_space<vmem>>, vector<8x30xf32>
    %cst_7 = arith.constant dense<0.000000e+00> : vector<8x256xf32>
    %15 = tpu.matmul %14, %11, %cst_7 {dimension_numbers = #tpu.dot_dimension_numbers<[1], [0], [0], [1], [0, 0, 1, 1], [], []>} : vector<8x30xf32>, vector<30x256xf32>, vector<8x256xf32> -> vector<8x256xf32>
    %c0_8 = arith.constant 0 : index
    %c0_9 = arith.constant 0 : index
    %16 = vector.load %arg5[%c0_8, %c0_9] : memref<5x24xf32, #tpu.memory_space<vmem>>, vector<5x24xf32>
    %cst_10 = arith.constant dense<0.000000e+00> : vector<5x256xf32>
    %17 = tpu.matmul %16, %13, %cst_10 {dimension_numbers = #tpu.dot_dimension_numbers<[1], [0], [0], [1], [0, 0, 1, 1], [], []>} : vector<5x24xf32>, vector<24x256xf32>, vector<5x256xf32> -> vector<5x256xf32>
    %c0_11 = arith.constant 0 : index
    %c0_12 = arith.constant 0 : index
    %18 = vector.load %arg6[%c0_11, %c0_12] : memref<5x8xf32, #tpu.memory_space<vmem>>, vector<5x8xf32>
    %cst_13 = arith.constant dense<0.000000e+00> : vector<5x256xf32>
    %19 = tpu.matmul %18, %15, %cst_13 {dimension_numbers = #tpu.dot_dimension_numbers<[1], [0], [0], [1], [0, 0, 1, 1], [], []>} : vector<5x8xf32>, vector<8x256xf32>, vector<5x256xf32> -> vector<5x256xf32>
    %20 = arith.addf %17, %19 : vector<5x256xf32>
    %c0_14 = arith.constant 0 : index
    %c0_15 = arith.constant 0 : index
    %21 = vector.load %arg7[%c0_14, %c0_15] : memref<5x1xf32, #tpu.memory_space<vmem>>, vector<5x1xf32>
    %22 = vector.broadcast %21 : vector<5x1xf32> to vector<5x256xf32>
    %23 = arith.addf %20, %22 : vector<5x256xf32>
    %24 = tpu.iota {dimensions = array<i32: 0>} : vector<5x256xi32>
    %cst_16 = arith.constant dense<0xFF800000> : vector<256xf32>
    %25 = vector.multi_reduction <maximumf>, %23, %cst_16 [0] : vector<5x256xf32> to vector<256xf32>
    %26 = vector.shape_cast %25 : vector<256xf32> to vector<1x256xf32>
    %27 = vector.broadcast %26 : vector<1x256xf32> to vector<5x256xf32>
    %28 = arith.cmpf oeq, %23, %27 : vector<5x256xf32>
    %c5_i32 = arith.constant 5 : i32
    %29 = vector.broadcast %c5_i32 : i32 to vector<5x256xi32>
    %30 = arith.select %28, %24, %29 : vector<5x256xi1>, vector<5x256xi32>
    %cst_17 = arith.constant dense<2147483647> : vector<256xi32>
    %31 = vector.multi_reduction <minsi>, %30, %cst_17 [0] : vector<5x256xi32> to vector<256xi32>
    %32 = vector.shape_cast %31 : vector<256xi32> to vector<1x256xi32>
    %c0_18 = arith.constant 0 : index
    %c0_19 = arith.constant 0 : index
    %33 = vector.load %arg8[%c0_18, %c0_19] : memref<1x256xi32, #tpu.memory_space<vmem>>, vector<1x256xi32>
    tpu.vector_store %arg8[%c0_18, %c0_19], %32 {strides = array<i32>} : memref<1x256xi32, #tpu.memory_space<vmem>>, vector<1x256xi32>,
    return
  }
  func.func @transform_0(%arg0: i32) -> (i32, i32) {
    %c0_i32 = arith.constant 0 : i32
    %c0_i32_0 = arith.constant 0 : i32
    return %arg0, %c0_i32 : i32, i32
  }
  func.func @transform_1(%arg0: i32) -> (i32, i32) {
    %c0_i32 = arith.constant 0 : i32
    %c0_i32_0 = arith.constant 0 : i32
    return %arg0, %c0_i32 : i32, i32
  }
  func.func @transform_2(%arg0: i32) -> (i32, i32) {
    %c0_i32 = arith.constant 0 : i32
    %c0_i32_0 = arith.constant 0 : i32
    %c0_i32_1 = arith.constant 0 : i32
    return %c0_i32, %c0_i32_0 : i32, i32
  }
  func.func @transform_3(%arg0: i32) -> (i32, i32) {
    %c0_i32 = arith.constant 0 : i32
    %c0_i32_0 = arith.constant 0 : i32
    %c0_i32_1 = arith.constant 0 : i32
    return %c0_i32, %c0_i32_0 : i32, i32
  }
  func.func @transform_4(%arg0: i32) -> (i32, i32) {
    %c0_i32 = arith.constant 0 : i32
    %c0_i32_0 = arith.constant 0 : i32
    %c0_i32_1 = arith.constant 0 : i32
    return %c0_i32, %c0_i32_0 : i32, i32
  }
  func.func @transform_5(%arg0: i32) -> (i32, i32) {
    %c0_i32 = arith.constant 0 : i32
    %c0_i32_0 = arith.constant 0 : i32
    %c0_i32_1 = arith.constant 0 : i32
    return %c0_i32, %c0_i32_0 : i32, i32
  }
  func.func @transform_6(%arg0: i32) -> (i32, i32) {
    %c0_i32 = arith.constant 0 : i32
    %c0_i32_0 = arith.constant 0 : i32
    %c0_i32_1 = arith.constant 0 : i32
    return %c0_i32, %c0_i32_0 : i32, i32
  }
  func.func @transform_7(%arg0: i32) -> (i32, i32) {
    %c0_i32 = arith.constant 0 : i32
    %c0_i32_0 = arith.constant 0 : i32
    return %arg0, %c0_i32 : i32, i32
  }
}

</mosaic_0001>

<bundles_post_ra>
// kernel: tagger_unaries_argmax.1
= control target key start
LH: loop header
LB: loop body
LE: loop exit
PB: predicated region body
PF: predicated region fallthrough
CT: control target
= control target key end

     0   :  { %v28_v0 = vlaneseq  ;;  %v611_v1 = vmov 0.0   ;;  %v612_v16 = vmov 1.0|1.0   ;;  %v613_v21 = vmov 1.0   ;;  %s742_s0 = inlined_call_operand.vmem [shape: s32[1,256], index: 0, kind: input, shape index: {}]   ;;  %s743_s1 = inlined_call_operand.vmem [shape: s32[1,256], index: 1, kind: input, shape index: {}]   ;;  %s744_s3 = inlined_call_operand.vmem [shape: f32[8,30], index: 3, kind: input, shape index: {}]   ;;  %s745_s2 = inlined_call_operand.vmem [shape: f32[24,50], index: 2, kind: input, shape index: {}]   ;;  %s746_s6 = inlined_call_operand.vmem [shape: f32[5,1], index: 6, kind: input, shape index: {}]   ;;  %s747_s5 = inlined_call_operand.vmem [shape: f32[5,8], index: 5, kind: input, shape index: {}]   ;;  %s748_s4 = inlined_call_operand.vmem [shape: f32[5,24], index: 4, kind: input, shape index: {}]   ;;  %s749_s7 = inlined_call_operand.vmem [shape: s32[1,256], index: 7, kind: output, shape index: {}]  }
   0x1   :  { %202 = vmatprep.mubr.f32.mxu0 %v611_v1  ;;  %297 = vmatprep.mubr.f32.mxu1 %v611_v1  ;;  %v26_v3 = vld [vmem:[%s742_s0] sm:$0x3]  ;;  %v119_v28 = vld [vmem:[%s745_s2 + $0x8] sm:$0xff]  ;;  %v120_v29 = vld [vmem:[%s745_s2 + $0x10] sm:$0xff]  ;;  %v614_v30 = vmov 0  }
   0x2   :  { %v659_v2 = vshrl.u32 %v28_v0, 7  ;;  %v27_v4 = vld [vmem:[%s743_s1] sm:$0x3]  ;;  %610 = vset.pattern.permute.xlu0 %v614_v30 }
   0x3   :  { %v221_v25 = vld [vmem:[%s744_s3] sm:$0xff] }
   0x4   :  { %v30_v5 = vadd.s32 8, %v659_v2  ;;  %v42_v6 = vsub.s32 1, %v659_v2  ;;  %v38_v7 = vsub.s32 0, %v659_v2  ;;  %v31_v8 = vadd.s32 16, %v659_v2  ;;  %v118_v27 = vld [vmem:[%s745_s2] sm:$0xff] }
   0x5   :  { %v32_v9 = vadd.s32 24, %v659_v2  ;;  %v33_v14 = vadd.s32 32, %v659_v2  ;;  %v34_v15 = vadd.s32 40, %v659_v2  ;;  %v35_v17 = vadd.s32 48, %v659_v2  ;;  %v456_v31 = vld [vmem:[%s746_s6] sm:$0x1f] }
   0x6   :  { %v43_v10 = vrot.slane %v26_v3, %v42_v6  ;;  %v672_v11 = vrot.slane %v26_v3, %v38_v7  ;;  %v93_v12 = vrot.slane %v27_v4, %v42_v6  ;;  %v89_v13 = vrot.slane %v27_v4, %v38_v7  ;;  %459 = vperm.xlu0 %610, %v456_v31   ;;  %v305_v34 = vld [vmem:[%s747_s5] sm:$0x1f] }
   0x7   :  { %v304_v43 = vld [vmem:[%s748_s4] sm:$0x1f] }
   0x8   :  { %vm45_vm0 = vcmp.eq.s32.totalorder %v659_v2, %v43_v10  ;;  %vm47_vm1 = vcmp.eq.s32.totalorder %v30_v5, %v43_v10  ;;  %vm44_vm2 = vcmp.eq.s32.totalorder %v659_v2, %v672_v11  ;;  %vm46_vm3 = vcmp.eq.s32.totalorder %v30_v5, %v672_v11 }
   0x9   :  { %vm577_vm4 = vmpackc.low %vm47_vm1, %vm45_vm0  ;;  %vm49_vm5 = vcmp.eq.s32.totalorder %v31_v8, %v43_v10  ;;  %vm51_vm6 = vcmp.eq.s32.totalorder %v32_v9, %v43_v10  ;;  %vm48_vm7 = vcmp.eq.s32.totalorder %v31_v8, %v672_v11  ;;  %vm50_vm8 = vcmp.eq.s32.totalorder %v32_v9, %v672_v11 }
   0xa   :  { %578 = vmatprep.subr.msk.bf16.mxu0 %vm577_vm4, %v612_v16  ;;  %vm579_vm9 = vmpackc.low %vm46_vm3, %vm44_vm2  ;;  %vm95_vm10 = vcmp.eq.s32.totalorder %v659_v2, %v93_v12  ;;  %vm97_vm11 = vcmp.eq.s32.totalorder %v30_v5, %v93_v12  ;;  %vm94_vm13 = vcmp.eq.s32.totalorder %v659_v2, %v89_v13  ;;  %vm96_vm14 = vcmp.eq.s32.totalorder %v30_v5, %v89_v13 }
   0xb   :  { %580 = vmatpush1.bf16.msk.msra.mxu0 %vm579_vm9, %v612_v16  ;;  %vm581_vm12 = vmpackc.low %vm51_vm6, %vm49_vm5  ;;  %vm53_vm0 = vcmp.eq.s32.totalorder %v33_v14, %v43_v10  ;;  %vm55_vm1 = vcmp.eq.s32.totalorder %v34_v15, %v43_v10  ;;  %vm101_vm4 = vcmp.eq.s32.totalorder %v32_v9, %v93_v12  ;;  %vm100_vm2 = vcmp.eq.s32.totalorder %v32_v9, %v89_v13 }
   0xc   :  { %582 = vmatprep.subr.msk.bf16.mxu0 %vm581_vm12, %v612_v16  ;;  %vm685_vm15 = vmpackc.low %vm50_vm8, %vm48_vm7  ;;  %vm52_vm9 = vcmp.eq.s32.totalorder %v33_v14, %v672_v11  ;;  %vm54_vm5 = vcmp.eq.s32.totalorder %v34_v15, %v672_v11  ;;  %v548_v19 = vsel %vm101_vm4, 1.0, %v611_v1  ;;  %v547_v20 = vsel %vm100_vm2, 1.0, %v611_v1 }
   0xd   :  { %vm589_vm3 = vmpackc.low %vm97_vm11, %vm95_vm10  ;;  %vm99_vm12 = vcmp.eq.s32.totalorder %v31_v8, %v93_v12  ;;  %vm226_vm7 = vcmask 1045504   ;;  %v593_v22 = vpack.c.bf16 %v548_v19, %v613_v21  ;;  %vm57_vm8 = vcmp.eq.s32.totalorder %v35_v17, %v43_v10 }
   0xe   :  { %590 = vmatprep.subr.msk.bf16.mxu1 %vm589_vm3, %v612_v16  ;;  %vm591_vm6 = vmpackc.low %vm96_vm14, %vm94_vm13  ;;  %vm98_vm11 = vcmp.eq.s32.totalorder %v31_v8, %v89_v13  ;;  %v596_v23 = vpack.c.bf16 %v547_v20, %v613_v21  ;;  %v540_v24 = vsel %vm57_vm8, 1.0, %v611_v1  ;;  %vm131_vm4 = vcmask 1041408  }
   0xf   :  { %584 = vmatpush1.bf16.msk.msra.mxu0 %vm685_vm15, %v612_v16  ;;  %592 = vmatpush1.bf16.msk.msra.mxu1 %vm591_vm6, %v612_v16  ;;  %vm585_vm10 = vmpackc.low %vm55_vm1, %vm53_vm0  ;;  %vm56_vm2 = vcmp.eq.s32.totalorder %v35_v17, %v672_v11  ;;  %vm222_vm0 = vcmask 244736   ;;  %vm121_vm1 = vcmask 408576   ;;  %vm306_vm3 = vcmask 64512  }
  0x10   :  { %586 = vmatprep.subr.msk.bf16.mxu0 %vm585_vm10, %v612_v16  ;;  %vm587_vm13 = vmpackc.low %vm54_vm5, %vm52_vm9  ;;  %v539_v26 = vsel %vm56_vm2, 1.0, %v611_v1  ;;  %vm381_vm9 = vcmask 195584   ;;  %vm464_vm5 = vcmask 1044480   ;;  %v615_v8 = vmov 1966171168  }
  0x11   :  { %vm594_vm14 = vmpackc.low %vm226_vm7, %vm99_vm12  ;;  %v505_v9 = vunpack.c.l.s4 %v615_v8 }
  0x12   :  { %595 = vmatprep.subr.msk.bf16.mxu1 %vm594_vm14, %v593_v22  ;;  %vm597_vm15 = vmpackc.low %vm226_vm7, %vm98_vm11 }
  0x13   :  { %588 = vmatpush1.bf16.msk.msra.mxu0 %vm587_vm13, %v612_v16  ;;  %598 = vmatpush1.bf16.msk.msra.mxu1 %vm597_vm15, %v596_v23  ;;  %v506_v14 = vunpack.c.0.s8 %v505_v9 }
  0x14   :  { %561 = vmatprep.subr.msk.mxu0 %vm131_vm4, %v540_v24 }
  0x15   :  { %v509_v19 = vsub.s32 %v506_v14, %v659_v2 }
  0x16   :  { %574 = vmatmul.mubr.msk.f32.vlgmr.msra.gmra.mrb[0].mxu1 %vm222_vm0, %v221_v25 }
  0x17   :  { %562 = vmatpush1.msk.msra.mxu0 %vm131_vm4, %v539_v26  ;;  %374 = vmatprep.mubr.f32.mxu1 %v611_v1  ;;  %vm520_vm4 = vcmp.lt.s32.totalorder %v28_v0, 256 }
  0x18   :  { %563 = vmatmul.mubr.msk.f32.vlgmr.msra.gmra.mrb[0].mxu0 %vm121_vm1, %v118_v27 }
  0x19   :  { %208 = vmatprep.mubr.f32.mxu0 %v611_v1 }
  0x1c   :  { %564 = vmatmul.mubr.msk.f32.gmra.mrb[2].mxu0 %vm121_vm1, %v119_v28 }
  0x1d   :  { %214 = vmatprep.mubr.f32.mxu0 %v611_v1 }
  0x20   :  { %565 = vmatmul.mubr.msk.f32.gmra.mrb[4].mxu0 %vm121_vm1, %v120_v29 }
  0x85   :  { %v460_v44 = vpop.permute.xlu0 %459 }
  0xe9   :  { %v299_v32 = vpop.f32.mrb[0].mxu1 }
  0xea   :  { %v301_v33 = vpop.f32.mrb[1].mxu1 }
  0xeb   :  { %v204_v35 = vpop.f32.mrb[0].mxu0  ;;  %310 = vmatprep.subr.mxu1 %v301_v33 }
  0xec   :  { %v206_v36 = vpop.f32.mrb[1].mxu0  ;;  %311 = vmatpush1.msra.mxu1 %v299_v32 }
  0xed   :  { %575 = vmatmul.mubr.msk.f32.vlgmr.msra.gmra.mrb[2].mxu1 %vm306_vm3, %v305_v34 }
  0xee   :  { %449 = vmatprep.mubr.f32.mxu1 %v611_v1 }
  0xef   :  { %v210_v37 = vpop.f32.mrb[2].mxu0 }
  0xf0   :  { %v601_v38 = vpack.c.bf16 %v210_v37, %v204_v35  ;;  %v212_v39 = vpop.f32.mrb[3].mxu0 }
  0xf1   :  { %v599_v40 = vpack.c.bf16 %v212_v39, %v206_v36 }
  0xf3   :  { %600 = vmatprep.subr.bf16.mxu1 %v599_v40  ;;  %v216_v41 = vpop.f32.mrb[4].mxu0 }
  0xf4   :  { %602 = vmatpush1.bf16.msra.mxu1 %v601_v38  ;;  %v218_v42 = vpop.f32.mrb[5].mxu0 }
  0xf5   :  { %389 = vmatprep.subr.mxu1 %v218_v42 }
  0xf8   :  { %390 = vmatpush1.msra.mxu1 %v216_v41 }
  0xf9   :  { %576 = vmatmul.mubr.msk.f32.vlgmr.msra.gmra.mrb[2].mxu1 %vm381_vm9, %v304_v43 }
 0x1cc   :  { %v451_v45 = vpop.f32.mrb[2].mxu1 }
 0x1cd   :  { %v462_v46 = vadd.f32 %v460_v44, %v451_v45  ;;  %v453_v47 = vpop.f32.mrb[3].mxu1 }
 0x1ce   :  { %v463_v48 = vadd.f32 %v460_v44, %v453_v47 }
 0x1cf   :  { %v465_v49 = vsel %vm464_vm5, %v462_v46, -inf }
 0x1d0   :  { %v466_v50 = vrot.slane %v465_v49, 4  ;;  %v472_v51 = vsel %vm464_vm5, %v463_v48, -inf }
 0x1d1   :  { %v473_v52 = vrot.slane %v472_v51, 4 }
 0x1d2   :  { %v467_v53 = vmax.f32 %v465_v49, %v466_v50 }
 0x1d3   :  { %v474_v54 = vmax.f32 %v472_v51, %v473_v52 }
 0x1d4   :  { %v468_v55 = vrot.slane %v467_v53, 2 }
 0x1d5   :  { %v475_v56 = vrot.slane %v474_v54, 2 }
 0x1d6   :  { %v469_v57 = vmax.f32 %v467_v53, %v468_v55 }
 0x1d7   :  { %v476_v58 = vmax.f32 %v474_v54, %v475_v56 }
 0x1d8   :  { %v470_v59 = vrot.slane %v469_v57, 1 }
 0x1d9   :  { %v477_v60 = vrot.slane %v476_v58, 1 }
 0x1da   :  { %v471_v61 = vmax.f32 %v469_v57, %v470_v59 }
 0x1db   :  { %v478_v62 = vmax.f32 %v476_v58, %v477_v60 }
 0x1dc   :  { %vm479_vm6 = vcmp.eq.f32.partialorder %v462_v46, %v471_v61 }
 0x1dd   :  { %v481_v63 = vsel %vm479_vm6, %v659_v2, 5  ;;  %vm480_vm12 = vcmp.eq.f32.partialorder %v463_v48, %v478_v62 }
 0x1de   :  { %v483_v1 = vsel %vm464_vm5, %v481_v63, 2147483647  ;;  %v482_v3 = vsel %vm480_vm12, %v659_v2, 5 }
 0x1df   :  { %v484_v4 = vrot.slane %v483_v1, 4  ;;  %v493_v5 = vsel %vm464_vm5, %v482_v3, 2147483647 }
 0x1e0   :  { %v494_v6 = vrot.slane %v493_v5, 4 }
 0x1e1   :  { %vm485_vm7 = vcmp.lt.s32.totalorder %v483_v1, %v484_v4 }
 0x1e2   :  { %v486_v7 = vsel %vm485_vm7, %v483_v1, %v484_v4  ;;  %vm495_vm8 = vcmp.lt.s32.totalorder %v493_v5, %v494_v6 }
 0x1e3   :  { %v487_v10 = vrot.slane %v486_v7, 2  ;;  %v496_v11 = vsel %vm495_vm8, %v493_v5, %v494_v6 }
 0x1e4   :  { %v497_v12 = vrot.slane %v496_v11, 2 }
 0x1e5   :  { %vm488_vm10 = vcmp.lt.s32.totalorder %v486_v7, %v487_v10 }
 0x1e6   :  { %v489_v13 = vsel %vm488_vm10, %v486_v7, %v487_v10  ;;  %vm498_vm11 = vcmp.lt.s32.totalorder %v496_v11, %v497_v12 }
 0x1e7   :  { %v490_v15 = vrot.slane %v489_v13, 1  ;;  %v499_v16 = vsel %vm498_vm11, %v496_v11, %v497_v12 }
 0x1e8   :  { %v500_v17 = vrot.slane %v499_v16, 1 }
 0x1e9   :  { %vm491_vm13 = vcmp.lt.s32.totalorder %v489_v13, %v490_v15 }
 0x1ea   :  { %v492_v18 = vsel %vm491_vm13, %v489_v13, %v490_v15  ;;  %vm501_vm14 = vcmp.lt.s32.totalorder %v499_v16, %v500_v17 }
 0x1eb   :  { %v502_v20 = vsel %vm501_vm14, %v499_v16, %v500_v17 }
 0x1ec   :  { %v503_v21 = vcombine.low %v492_v18, %v502_v20 }
 0x1ee   :  { %v510_v22 = vrot.slane %v503_v21, %v509_v19 }
 0x1f0   :  { %v517_v23 = vrot.slane %v510_v22, %v509_v19 }
 0x1f2   :  { %522 = vst.msk [vmem:[%s749_s7] sm:$0x3] %vm520_vm4, %v517_v23 }

</bundles_post_ra>
